<compile_context>
chip_gen: v6e
topology: v6e:2x2x1
jax: 0.10.0
libtpu: 0.0.40
codegen_flags: <defaults>
</compile_context>

<pallas_src>
import jax
import jax.numpy as jnp
from jax.experimental import pallas as pl
from jax.experimental.pallas import tpu as pltpu


# ----------------- branch 1: transposed_conv=False, mode='nearest' -----------------

def _nearest_kernel(x_ref, sd_ref, b_ref, o_ref):
    # x_ref: (1, D, H*W)   sd_ref: (Do, D)   b_ref: (H*W, Ho*Wo)   o_ref: (1, Do, Ho*Wo)
    t = jnp.dot(sd_ref[...], x_ref[0], preferred_element_type=jnp.float32)     # (Do, HW)
    o = jnp.dot(t.astype(b_ref.dtype), b_ref[...],
                preferred_element_type=jnp.float32)                            # (Do, HoWo)
    o_ref[0] = o.astype(o_ref.dtype)


def upsample_nearest_pallas(x, out_size):
    """F.interpolate(x, size=out_size, mode='nearest') for 5-D NCDHW input."""
    N, C, D, H, W = x.shape
    Do, Ho, Wo = out_size
    HW, HoWo = H * W, Ho * Wo
    dt = x.dtype
    xr = x.reshape(N * C, D, HW)          # free bitcast

    # PyTorch 'nearest': src = floor(dst * in / out) -> exact 0/1 selection matrices.
    d_src = (jnp.arange(Do) * D) // Do
    h_src = (jnp.arange(Ho) * H) // Ho
    w_src = (jnp.arange(Wo) * W) // Wo
    Sd = (d_src[:, None] == jnp.arange(D)[None, :]).astype(dt)        # (Do, D)
    Bh = (h_src[:, None] == jnp.arange(H)[None, :]).astype(dt)        # (Ho, H)
    Bw = (w_src[:, None] == jnp.arange(W)[None, :]).astype(dt)        # (Wo, W)
    # B[(h*W+w), (ho*Wo+wo)] = [h == h_src[ho]] * [w == w_src[wo]]
    B = jnp.einsum('oh,pw->hwop', Bh, Bw).reshape(HW, HoWo)
    # TODO(synk): B is O(H*W*Ho*Wo); for very large slabs split the H/W selection
    # into two matmuls (per-Do grid) instead of one kron matrix.

    out = pl.pallas_call(
        _nearest_kernel,
        out_shape=jax.ShapeDtypeStruct((N * C, Do, HoWo), dt),
        grid=(N * C,),
        in_specs=[
            pl.BlockSpec((1, D, HW), lambda i: (i, 0, 0)),
            pl.BlockSpec((Do, D), lambda i: (0, 0)),
            pl.BlockSpec((HW, HoWo), lambda i: (0, 0)),
        ],
        out_specs=pl.BlockSpec((1, Do, HoWo), lambda i: (i, 0, 0)),
        compiler_params=pltpu.CompilerParams(
            dimension_semantics=("parallel",)),
    )(xr, Sd, B)
    return out.reshape(N, C, Do, Ho, Wo)   # free bitcast


# ----------------- branch 2: transposed_conv=True (learned ConvTranspose3d) --------

def _convT_kernel(x0_ref, x1_ref, w0_ref, w1_ref, o_ref):
    # x0/x1: (1, 1, 4*Ci, H*W) -- (dh, dw) shifted windows at depth qd / qd+1
    # w0/w1: (8*Co, 4*Ci)      -- polyphase weights for depth offset 0 / 1
    acc = jnp.dot(w0_ref[...], x0_ref[0, 0], preferred_element_type=jnp.float32)
    acc = acc + jnp.dot(w1_ref[...], x1_ref[0, 0], preferred_element_type=jnp.float32)
    o_ref[0, 0] = acc.astype(o_ref.dtype)


def _polyphase_weights(weight):
    """weight (Ci, Co, 3, 3, 3) -> (Wc0, Wc1) each (8*Co, 4*Ci).

    Row index  = ((pd*2 + ph)*2 + pw)*Co + co   (output parity group, channel)
    Col index  = ((dh*2 + dw))*Ci + ci          (neighbourhood offset, channel)
    Per-dim tap: weight index a = 1 + p - 2*d  (invalid, i.e. zero, iff p==0,d==1).
    """
    Ci, Co = weight.shape[0], weight.shape[1]
    Wc = jnp.zeros((2, 2, 2, Co, 2, 2, 2, Ci), weight.dtype)
    for pd in range(2):
        for ph in range(2):
            for pw in range(2):
                for dd in range(2):
                    for dh in range(2):
                        for dw in range(2):
                            ad = 1 + pd - 2 * dd
                            ah = 1 + ph - 2 * dh
                            aw = 1 + pw - 2 * dw
                            if ad >= 0 and ah >= 0 and aw >= 0:
                                Wc = Wc.at[pd, ph, pw, :, dd, dh, dw, :].set(
                                    weight[:, :, ad, ah, aw].T)
    Wc = Wc.reshape(8 * Co, 8 * Ci)
    return Wc[:, :4 * Ci], Wc[:, 4 * Ci:]          # split on depth offset dd = 0 / 1


def conv_transpose3d_pallas(x, weight, bias, out_size, stride=(2, 2, 2), padding=1):
    """nn.ConvTranspose3d(Ci, Co, k=3, stride=(2,2,2), padding=1)(x, output_size=out_size)."""
    N, Ci, D, H, W = x.shape
    Co, K = weight.shape[1], weight.shape[2]
    Do, Ho, Wo = out_size
    # TODO(synk): polyphase path is specialised to the module defaults
    # (kernel_size=3, stride=(2,2,2), padding=1); other configs unsupported.
    assert K == 3 and tuple(stride) == (2, 2, 2) and padding == 1
    for o_, i_ in zip((Do, Ho, Wo), (D, H, W)):
        assert 0 <= o_ - (2 * i_ - 1) < 2, \
            "requested output size not reachable with stride 2"

    HW = H * W
    # ---- glue (plain JAX, O(4*|x|), NOT a 27x im2col): pad high by 1 and build
    # the 2x2 (dh, dw) shifted windows, lane-dense as (N, D+1, 4*Ci, H*W). ----
    xe = jnp.pad(x, ((0, 0), (0, 0), (0, 1), (0, 1), (0, 1)))
    wins = [xe[:, :, :, dh:dh + H, dw:dw + W] for dh in range(2) for dw in range(2)]
    xw = jnp.stack(wins, axis=2)                       # (N, Ci, 4, D+1, H, W)
    xw = xw.transpose(0, 3, 2, 1, 4, 5).reshape(N, D + 1, 4 * Ci, HW)

    Wc0, Wc1 = _polyphase_weights(weight.astype(x.dtype))

    out = pl.pallas_call(
        _convT_kernel,
        out_shape=jax.ShapeDtypeStruct((N, D, 8 * Co, HW), x.dtype),
        grid=(N, D),
        in_specs=[
            pl.BlockSpec((1, 1, 4 * Ci, HW), lambda n, d: (n, d, 0, 0)),
            pl.BlockSpec((1, 1, 4 * Ci, HW), lambda n, d: (n, d + 1, 0, 0)),
            pl.BlockSpec((8 * Co, 4 * Ci), lambda n, d: (0, 0)),
            pl.BlockSpec((8 * Co, 4 * Ci), lambda n, d: (0, 0)),
        ],
        out_specs=pl.BlockSpec((1, 1, 8 * Co, HW), lambda n, d: (n, d, 0, 0)),
        compiler_params=pltpu.CompilerParams(
            dimension_semantics=("parallel", "parallel"),
            vmem_limit_bytes=64 * 1024 * 1024),
    )(xw, xw, Wc0, Wc1)

    # Parity de-interleave (single fused XLA pass: transpose + bias add + crop).
    # Kernel row r = ((pd*2+ph)*2+pw)*Co + co, column = qh*W + qw.
    out = out.reshape(N, D, 2, 2, 2, Co, H, W)                    # n,qd,pd,ph,pw,co,qh,qw
    out = out.transpose(0, 5, 1, 2, 6, 3, 7, 4)                   # n,co,qd,pd,qh,ph,qw,pw
    out = out.reshape(N, Co, 2 * D, 2 * H, 2 * W)
    out = out + bias.reshape(1, Co, 1, 1, 1).astype(out.dtype)
    return out[:, :, :Do, :Ho, :Wo]


# ----------------- module-equivalent forward ---------------------------------------

def upsampling_forward(encoder_features, x, *, transposed_conv,
                       weight=None, bias=None, scale_factor=(2, 2, 2), mode='nearest'):
    """Upsampling.forward(encoder_features, x)."""
    out_size = encoder_features.shape[2:]
    if transposed_conv:
        return conv_transpose3d_pallas(x, weight, bias, out_size, stride=scale_factor)
    # TODO(synk): only mode='nearest' (the module default) is implemented;
    # linear/bilinear/trilinear/area are not supported.
    assert mode == 'nearest'
    return upsample_nearest_pallas(x, out_size)


# ----------------- plain-JAX references (for sanity check) -------------------------

def _nearest_ref(x, size):
    _, _, D, H, W = x.shape
    Do, Ho, Wo = size
    di = (jnp.arange(Do) * D) // Do
    hi = (jnp.arange(Ho) * H) // Ho
    wi = (jnp.arange(Wo) * W) // Wo
    return x[:, :, di][:, :, :, hi][:, :, :, :, wi]


def _convT_ref(x, weight, bias, out_size, stride=(2, 2, 2), padding=1):
    K = weight.shape[2]
    lo = K - 1 - padding
    op = tuple(out_size[i] - ((x.shape[2 + i] - 1) * stride[i] + K - 2 * padding)
               for i in range(3))
    rhs = jnp.flip(weight, (2, 3, 4)).transpose(1, 0, 2, 3, 4)  # (Co, Ci, K, K, K)
    out = jax.lax.conv_general_dilated(
        x, rhs, window_strides=(1, 1, 1),
        padding=[(lo, lo + op[i]) for i in range(3)],
        lhs_dilation=stride,
        dimension_numbers=('NCDHW', 'OIDHW', 'NCDHW'),
        precision=jax.lax.Precision.HIGHEST)
    return out + bias[None, :, None, None, None]


if __name__ == "__main__":
    key = jax.random.PRNGKey(0)
    k1, k2, k3, k4 = jax.random.split(key, 4)
    N, Cin, Cout = 2, 4, 4
    D = H = W = 8
    Do = Ho = Wo = 16

    x = jax.random.normal(k1, (N, Cin, D, H, W), dtype=jnp.float32)
    encoder_features = jax.random.normal(k2, (N, Cout, Do, Ho, Wo), dtype=jnp.float32)

    # branch 1: transposed_conv=False, mode='nearest'
    out_near = jax.block_until_ready(
        upsampling_forward(encoder_features, x, transposed_conv=False))
    ref_near = _nearest_ref(x, (Do, Ho, Wo))
    assert out_near.shape == (N, Cin, Do, Ho, Wo)
    assert jnp.allclose(out_near, ref_near, atol=1e-4, rtol=1e-4)

    # branch 2: transposed_conv=True (ConvTranspose3d k=3, stride=(2,2,2), pad=1)
    weight = 0.05 * jax.random.normal(k3, (Cin, Cout, 3, 3, 3), dtype=jnp.float32)
    bias = 0.1 * jax.random.normal(k4, (Cout,), dtype=jnp.float32)
    out_ct = jax.block_until_ready(
        upsampling_forward(encoder_features, x, transposed_conv=True,
                           weight=weight, bias=bias))
    ref_ct = _convT_ref(x, weight, bias, (Do, Ho, Wo))
    assert out_ct.shape == (N, Cout, Do, Ho, Wo)
    assert jnp.allclose(out_ct, ref_ct, atol=1e-3, rtol=1e-3)

    # odd output size (output_padding = 0 along d and w): exercises the crop path
    out_ct2 = jax.block_until_ready(
        conv_transpose3d_pallas(x, weight, bias, (15, 16, 15)))
    ref_ct2 = _convT_ref(x, weight, bias, (15, 16, 15))
    assert out_ct2.shape == (N, Cout, 15, 16, 15)
    assert jnp.allclose(out_ct2, ref_ct2, atol=1e-3, rtol=1e-3)

    print("KERNEL_OK")
</pallas_src>

<mosaic_0001>
module attributes {stable_mosaic.version = 11 : i64} {
  func.func @_nearest_kernel(%arg0: i32, %arg1: memref<1x8x64xf32, #tpu.memory_space<vmem>>, %arg2: memref<16x8xf32, #tpu.memory_space<vmem>>, %arg3: memref<64x256xf32, #tpu.memory_space<vmem>>, %arg4: memref<1x16x256xf32, #tpu.memory_space<vmem>>) attributes {dimension_semantics = [#tpu.dimension_semantics<parallel>], iteration_bounds = array<i64: 8>, scalar_prefetch = 0 : i64, scratch_operands = 0 : i64, tpu.core_type = #tpu.core_type<tc>, window_params = [{transform_indices = @transform_0, window_bounds = array<i64: 1, 8, 64>}, {pipeline_mode = #tpu.pipeline_mode<synchronous>, transform_indices = @transform_1, window_bounds = array<i64: 16, 8>}, {pipeline_mode = #tpu.pipeline_mode<synchronous>, transform_indices = @transform_2, window_bounds = array<i64: 64, 256>}, {transform_indices = @transform_3, window_bounds = array<i64: 1, 16, 256>}]} {
    %c0 = arith.constant 0 : index
    %c0_0 = arith.constant 0 : index
    %0 = vector.load %arg2[%c0, %c0_0] : memref<16x8xf32, #tpu.memory_space<vmem>>, vector<16x8xf32>
    %c0_1 = arith.constant 0 : index
    %c0_2 = arith.constant 0 : index
    %c0_3 = arith.constant 0 : index
    %1 = vector.load %arg1[%c0_1, %c0_2, %c0_3] : memref<1x8x64xf32, #tpu.memory_space<vmem>>, vector<1x8x64xf32>
    %2 = vector.shape_cast %1 : vector<1x8x64xf32> to vector<8x64xf32>
    %cst = arith.constant dense<0.000000e+00> : vector<16x64xf32>
    %3 = tpu.matmul %0, %2, %cst {dimension_numbers = #tpu.dot_dimension_numbers<[1], [0], [0], [1], [0, 0, 1, 1], [], []>} : vector<16x8xf32>, vector<8x64xf32>, vector<16x64xf32> -> vector<16x64xf32>
    %c0_4 = arith.constant 0 : index
    %c0_5 = arith.constant 0 : index
    %4 = vector.load %arg3[%c0_4, %c0_5] : memref<64x256xf32, #tpu.memory_space<vmem>>, vector<64x256xf32>
    %cst_6 = arith.constant dense<0.000000e+00> : vector<16x256xf32>
    %5 = tpu.matmul %3, %4, %cst_6 {dimension_numbers = #tpu.dot_dimension_numbers<[1], [0], [0], [1], [0, 0, 1, 1], [], []>} : vector<16x64xf32>, vector<64x256xf32>, vector<16x256xf32> -> vector<16x256xf32>
    %c0_7 = arith.constant 0 : index
    %c0_8 = arith.constant 0 : index
    %c0_9 = arith.constant 0 : index
    %6 = vector.load %arg4[%c0_7, %c0_8, %c0_9] : memref<1x16x256xf32, #tpu.memory_space<vmem>>, vector<1x16x256xf32>
    %7 = vector.shape_cast %6 : vector<1x16x256xf32> to vector<16x256xf32>
    %8 = vector.shape_cast %5 : vector<16x256xf32> to vector<1x16x256xf32>
    tpu.vector_store %arg4[%c0_7, %c0_8, %c0_9], %8 {strides = array<i32>} : memref<1x16x256xf32, #tpu.memory_space<vmem>>, vector<1x16x256xf32>,
    return
  }
  func.func @transform_0(%arg0: i32) -> (i32, i32, i32) {
    %c0_i32 = arith.constant 0 : i32
    %c0_i32_0 = arith.constant 0 : i32
    %c0_i32_1 = arith.constant 0 : i32
    return %arg0, %c0_i32, %c0_i32_0 : i32, i32, i32
  }
  func.func @transform_1(%arg0: i32) -> (i32, i32) {
    %c0_i32 = arith.constant 0 : i32
    %c0_i32_0 = arith.constant 0 : i32
    %c0_i32_1 = arith.constant 0 : i32
    return %c0_i32, %c0_i32_0 : i32, i32
  }
  func.func @transform_2(%arg0: i32) -> (i32, i32) {
    %c0_i32 = arith.constant 0 : i32
    %c0_i32_0 = arith.constant 0 : i32
    %c0_i32_1 = arith.constant 0 : i32
    return %c0_i32, %c0_i32_0 : i32, i32
  }
  func.func @transform_3(%arg0: i32) -> (i32, i32, i32) {
    %c0_i32 = arith.constant 0 : i32
    %c0_i32_0 = arith.constant 0 : i32
    %c0_i32_1 = arith.constant 0 : i32
    return %arg0, %c0_i32, %c0_i32_0 : i32, i32, i32
  }
}

</mosaic_0001>

<bundles_post_ra>
// kernel: tpu_custom_call.1
= control target key start
LH: loop header
LB: loop body
LE: loop exit
PB: predicated region body
PF: predicated region fallthrough
CT: control target
= control target key end

     0   :  { %8 = vsyncpa [#allocation3], 0  ;;  %s918_s0 = inlined_call_operand.hbm [shape: f32[8,8,64], index: 0, kind: input, shape index: {}]   ;;  %s919_s1 = inlined_call_operand.vmem [shape: f32[16,8], index: 1, kind: input, shape index: {}]   ;;  %s920_s2 = inlined_call_operand.hbm [shape: f32[64,256], index: 2, kind: input, shape index: {}]   ;;  %s921_s3 = inlined_call_operand.hbm [shape: f32[8,16,256], index: 3, kind: output, shape index: {}]  }
   0x1   :  { %10 = vsyncpa [#allocation3 + $0x1], 0 }
   0x2   :  { %11 = vsyncpa [#allocation6], 0 }
   0x3   :  { %12 = vsyncpa [#allocation4], 0 }
   0x4   :  { %14 = vsyncpa [#allocation4 + $0x1], 0  ;;  %s745_s12 = smov 0   ;;  %s747_s13 = smov 0  }
   0x5   :  { %s749_s14 = smov 0   ;;  %s751_s15 = smov 0  }
   0x6 LB: > { %s766_s16 = sadd.s32 4294967295, %s715_s15   ;;  %s487_s17 = sadd.s32 4294967294, %s715_s15   ;;  %s715_s15 = sphi %s751_s15, %s942_s15   ;;  %s711_s14 = sphi %s749_s14, %s941_s14   ;;  %s707_s13 = sphi %s747_s13, %s940_s13   ;;  %s703_s12 = sphi %s745_s12, %s939_s12  }
   0x7   : > { %p40_p0 = scmp.ne.s32.totalorder %s707_s13, %s703_s12  ;;  %p922_p1 = scmp.eq.s32.totalorder %s766_s16, 0 }
   0x8   : > { %p112_p3 = scmp.eq.s32.totalorder %s487_s17, 7  ;;  %p488_p5 = scmp.ge.s32.totalorder %s715_s15, 1 }
   0x9   : > { %p775_p4 = por %p922_p1, %p40_p0  ;;  %p119_p7 = scmp.lt.s32.totalorder %s715_s15, 9 }
   0xa   : > { %p780_p6 = por %p112_p3, %p40_p0  ;;  %s717_s21 = smov [#allocation5]  }
   0xb   : > { %s926_s18 = scalar_select %p775_p4, 1, 0 }
   0xc   : > { %s927_s19 = scalar_select %p780_p6, 1, 0 }
   0xd   : > { %p785_p8 = pnand %p488_p5, %p119_p7  ;;  %s134_s22 = sshll.u32 %s717_s21, 4  ;;  %s135_s22 = int_to_ptr.vmem [resolvable:$true] %s134_s22 }
   0xe   : > { %s798_s24 = sadd.s32 1, %s715_s15   ;;  %s27_s25 = sadd.s32 1, %s711_s14 }
   0xf   : > { %s928_s20 = scalar_select %p785_p8, 1, 0 }
  0x10   : > { %p539_p9 = pneg %p785_p8  ;;  %s24_s26 = ssub.s32 %s715_s15, %s798_s24 }
  0x11   : > { %s604_s27 = scalar_lea.vmem %s135_s22, 2048  ;;  %p612_p3 = scmp.lt.s32.totalorder %s135_s22, %s135_s22 }
  0x12   : > { %p793_p10 = pnand %p539_p9, %p922_p1  ;;  %p605_p12 = scmp.ne.s32.totalorder %s135_s22, %s604_s27 }
  0x13   : > { %p613_p5 = scmp.lt.s32.totalorder %s604_s27, %s604_s27 }
  0x14   : > { %p595_p11 = pneg %p793_p10 }
  0x15   : > { %p614_p7 = por %p613_p5, %p612_p3 }
  0x16   : > { %p607_p13 = pnand %p605_p12, %p595_p11 }
  0x18   : > { %p608_p0 = pneg %p607_p13 }
  0x1a   : > { %p615_p2 = pnand %p614_p7, %p608_p0 }
  0x1c   : > { %618 = shalt.err (!%p615_p2)
}
  0x1d   : > { %s718_s28 = smov 256   ;;  %s719_s29 = smov 16  }
  0x1e   : > { %542 = dma.hbm_to_vmem [thread:$0]  (!%p793_p10), %s920_s2, 2048, %s135_s22, [#allocation6], %s718_s28, %s718_s28, %s719_s29  }
  0x1f   : > { %p25_p9 = scmp.eq.s32.totalorder %s24_s26, 0  ;;  %p34_p11 = scmp.ne.s32.totalorder %s711_s14, %s707_s13 }
  0x20   : > { %p35_p12 = scmp.eq.s32.totalorder %s715_s15, 0  ;;  %p552_p2 = scmp.lt.s32.totalorder %s715_s15, 8 }
  0x21   : > { %s815_s5 = scalar_select %p25_p9, %s711_s14, %s27_s25  }
  0x22   : > { %p36_p13 = por %p35_p12, %p34_p11  ;;  %p930_p0 = scmp.eq.s32.totalorder %s766_s16, 7 }
  0x23   : > { %s148_s7 = sand.u32 1, %s711_s14   ;;  %s492_s8 = sshll.u32 %s715_s15, 7 }
  0x24   : > { %p819_p3 = por %p930_p0, %p34_p11  ;;  %s491_s9 = sshll.u32 %s148_s7, 3 }
  0x25   : > { %s828_s17 = scalar_lea.hbm %s918_s0, %s492_s8  ;;  %s152_s21 = scalar_lea.vmem [#allocation2], %s491_s9 }
  0x26   : > { %s931_s6 = scalar_select %p819_p3, 1, 0 }
  0x27   : > { %s159_s22 = sshll.u32 %s152_s21, 4  ;;  %p830_p10 = pnand %p552_p2, %p36_p13  ;;  %s160_s22 = int_to_ptr.vmem [resolvable:$true] %s159_s22 }
  0x28   : > { %s149_s25 = scalar_lea.sflag [#allocation3], %s148_s7  ;;  %s619_s26 = scalar_lea.hbm %s828_s17, 128 }
  0x29   : > { %p620_p5 = scmp.ne.s32.totalorder %s828_s17, %s619_s26  ;;  %p621_p7 = pneg %p830_p10 }
  0x2a   : > { %s624_s29 = scalar_lea.hbm %s918_s0, 1024  ;;  %p625_p12 = scmp.lt.s32.totalorder %s828_s17, %s918_s0 }
  0x2b   : > { %p622_p9 = pnand %p621_p7, %p620_p5  ;;  %p626_p2 = scmp.lt.s32.totalorder %s624_s29, %s619_s26 }
  0x2d   : > { %p623_p11 = pneg %p622_p9  ;;  %p627_p13 = por %p626_p2, %p625_p12 }
  0x2f   : > { %p628_p0 = pnand %p627_p13, %p623_p11 }
  0x31   : > { %631 = shalt.err (!%p628_p0)
}
  0x32   : > { %s632_s8 = scalar_lea.vmem %s160_s22, 128  ;;  %s720_s7 = smov [#allocation2]  }
  0x33   : > { %p633_p1 = scmp.ne.s32.totalorder %s160_s22, %s632_s8  ;;  %s637_s9 = sshll.u32 %s720_s7, 4  ;;  %s638_s9 = int_to_ptr.vmem [resolvable:$false] %s637_s9 }
  0x34   : > { %s639_s10 = scalar_lea.vmem %s638_s9, 256  ;;  %p640_p5 = scmp.lt.s32.totalorder %s160_s22, %s638_s9 }
  0x35   : > { %p635_p6 = pnand %p633_p1, %p621_p7  ;;  %p641_p9 = scmp.lt.s32.totalorder %s639_s10, %s632_s8 }
  0x37   : > { %p636_p3 = pneg %p635_p6  ;;  %p642_p4 = por %p641_p9, %p640_p5 }
  0x39   : > { %p643_p8 = pnand %p642_p4, %p636_p3 }
  0x3b   : > { %646 = shalt.err (!%p643_p8)
}
  0x3c   : > { %546 = dma.hbm_to_vmem [thread:$0]  (!%p830_p10), %s828_s17, 128, %s160_s22, %s149_s25  }
  0x3d   : > { %p933_p11 = scmp.ne.s32.totalorder %s928_s20, 0 }
  0x3e   : > { %s851_s11 = sand.u32 (!%p933_p11), 1, %s707_s13   ;;  %p934_p1 = scmp.ne.s32.totalorder (!%p933_p11), %s926_s18, 0 }
  0x3f   : > { %168 = sbr.rel (%p933_p11) target bundleno = 479 (0x1df), region = 32  ;;  %s494_s21 = sshll.u32 (!%p933_p11), %s851_s11, 3 }
  0x40   : > { %s171_s26 = scalar_lea.sflag (!%p933_p11), [#allocation3], %s851_s11  ;;  %s174_s27 = scalar_lea.vmem (!%p933_p11), [#allocation2], %s494_s21 }
  0x44   : > { %690 = dma.done.wait (%p934_p1), %s171_s26, 128  }
  0x45   : > { %692 = vsyncadd (%p934_p1), %s171_s26, 4294967168  ;;  %p935_p4 = scmp.eq.s32.totalorder %s766_s16, 0 }
  0x47   : > { %694 = dma.done.wait (%p935_p4), [#allocation6], 2048   ;;  %p936_p6 = pmov %p935_p4 }
  0x48   : > { %vm204_vm0 = vcmask 64512   ;;  %v203_v0 = vld [vmem:[%s174_s27] sm:$0xff]  ;;  %v299_v5 = vld [vmem:[#allocation5 + $0x68] sm:$0xff]  ;;  %v298_v6 = vld [vmem:[#allocation5 + $0x60] sm:$0xff]  ;;  %v721_v19 = vmov 0.0   ;;  %vm302_vm1 = vcmask 523264  }
  0x49   : > { %696 = vsyncadd (%p936_p6), [#allocation6], 4294965248  ;;  %v201_v1 = vld [vmem:[%s919_s1] sm:$0xff]  ;;  %v202_v2 = vld [vmem:[%s919_s1 + $0x8] sm:$0xff]  ;;  %510 = vmatprep.subr.mxu0 %v203_v0  ;;  %379 = vmatprep.mubr.f32.mxu1 %v721_v19  ;;  %s496_s18 = sshll.u32 %s851_s11, 5  ;;  %s506_s29 = sshll.u32 %s766_s16, 9 }
  0x4a   : > { %512 = vmatprep.mubr.msk.f32.mxu0 %vm204_vm0, %v201_v1  ;;  %v301_v3 = vld [vmem:[#allocation5 + $0x78] sm:$0xff]  ;;  %v300_v4 = vld [vmem:[#allocation5 + $0x70] sm:$0xff]  ;;  %511 = vmatpush3.msra.mxu0 %v203_v0  ;;  %v295_v9 = vld [vmem:[#allocation5 + $0x48] sm:$0xff]  ;;  %s200_s25 = scalar_lea.vmem [#allocation7], %s496_s18  ;;  %s876_s8 = scalar_lea.hbm %s921_s3, %s506_s29 }
  0x4b   : > { %515 = vmatprep.subr.mxu1 %v301_v3  ;;  %513 = vmatmul.mubr.msk.f32.vlgmr.msra.gmra.mxu0 %vm204_vm0, %v202_v2  ;;  %v297_v7 = vld [vmem:[#allocation5 + $0x58] sm:$0xff]  ;;  %v296_v8 = vld [vmem:[#allocation5 + $0x50] sm:$0xff]  ;;  %v294_v10 = vld [vmem:[#allocation5 + $0x40] sm:$0xff]  ;;  %s404_s28 = sshll.u32 %s200_s25, 4  ;;  %s391_s7 = scalar_lea.sflag [#allocation4], %s851_s11  ;;  %s871_s28 = int_to_ptr.vmem [resolvable:$true] %s404_s28 }
  0x4c   : > { %523 = vmatpush1.msra.mxu1 %v300_v4  ;;  %325 = vmatprep.subr.mxu0 %v301_v3  ;;  %v293_v11 = vld [vmem:[#allocation5 + $0x38] sm:$0xff]  ;;  %v292_v12 = vld [vmem:[#allocation5 + $0x30] sm:$0xff]  ;;  %v291_v13 = vld [vmem:[#allocation5 + $0x28] sm:$0xff]  ;;  %s647_s16 = scalar_lea.vmem %s871_s28, 512  ;;  %p937_p3 = scmp.ne.s32.totalorder %s931_s6, 0 }
  0x4d   : > { %516 = vmatprep.subr.mxu1 %v299_v5  ;;  %326 = vmatpush1.msra.mxu0 %v300_v4  ;;  %v290_v14 = vld [vmem:[#allocation5 + $0x20] sm:$0xff]  ;;  %v289_v15 = vld [vmem:[#allocation5 + $0x18] sm:$0xff]  ;;  %v288_v16 = vld [vmem:[#allocation5 + $0x10] sm:$0xff]  ;;  %p648_p8 = scmp.ne.s32.totalorder %s871_s28, %s647_s16  ;;  %s722_s9 = smov [#allocation7]  }
  0x4e   : > { %524 = vmatpush1.msra.mxu1 %v298_v6  ;;  %327 = vmatprep.subr.mxu0 %v299_v5  ;;  %v287_v17 = vld [vmem:[#allocation5 + $0x8] sm:$0xff]  ;;  %v286_v18 = vld [vmem:[#allocation5] sm:$0xff]  ;;  %s651_s10 = sshll.u32 %s722_s9, 4  ;;  %s652_s10 = int_to_ptr.vmem [resolvable:$false] %s651_s10 }
  0x4f   : > { %517 = vmatprep.subr.mxu1 %v297_v7  ;;  %328 = vmatpush1.msra.mxu0 %v298_v6  ;;  %p649_p10 = pnand %p648_p8, %p937_p3  ;;  %s653_s21 = scalar_lea.vmem %s652_s10, 1024 }
  0x50   : > { %525 = vmatpush1.msra.mxu1 %v296_v8  ;;  %329 = vmatprep.subr.mxu0 %v297_v7  ;;  %p654_p12 = scmp.lt.s32.totalorder %s871_s28, %s652_s10  ;;  %p655_p2 = scmp.lt.s32.totalorder %s653_s21, %s647_s16 }
  0x51   : > { %518 = vmatprep.subr.mxu1 %v295_v9  ;;  %330 = vmatpush1.msra.mxu0 %v296_v8  ;;  %p650_p7 = pneg %p649_p10 }
  0x52   : > { %526 = vmatpush1.msra.mxu1 %v294_v10  ;;  %331 = vmatprep.subr.mxu0 %v295_v9  ;;  %p656_p13 = por %p655_p2, %p654_p12 }
  0x53   : > { %519 = vmatprep.subr.mxu1 %v293_v11  ;;  %332 = vmatpush1.msra.mxu0 %v294_v10 }
  0x54   : > { %527 = vmatpush1.msra.mxu1 %v292_v12  ;;  %333 = vmatprep.subr.mxu0 %v293_v11  ;;  %p657_p0 = pnand %p656_p13, %p650_p7 }
  0x55   : > { %520 = vmatprep.subr.mxu1 %v291_v13  ;;  %334 = vmatpush1.msra.mxu0 %v292_v12 }
  0x56   : > { %528 = vmatpush1.msra.mxu1 %v290_v14  ;;  %335 = vmatprep.subr.mxu0 %v291_v13 }
  0x57   : > { %521 = vmatprep.subr.mxu1 %v289_v15  ;;  %336 = vmatpush1.msra.mxu0 %v290_v14 }
  0x58   : > { %529 = vmatpush1.msra.mxu1 %v288_v16  ;;  %337 = vmatprep.subr.mxu0 %v289_v15 }
  0x59   : > { %522 = vmatprep.subr.mxu1 %v287_v17  ;;  %338 = vmatpush1.msra.mxu0 %v288_v16 }
  0x5a   : > { %339 = vmatprep.subr.mxu0 %v287_v17  ;;  %530 = vmatpush1.msra.mxu1 %v286_v18 }
  0x5b   : > { %340 = vmatpush1.msra.mxu0 %v286_v18  ;;  %373 = vmatprep.mubr.f32.mxu0 %v721_v19 }
 0x10b   : > { %v514_v20 = vpop.f32.mrf.mxu0 }
 0x10c   : > { %500 = vmatmul.mubr.msk.f32.vlgmr.msra.gmra.mxu1 %vm302_vm1, %v514_v20 }
 0x10d   : > { %v277_v21 = vpop.f32.mrf.mxu0 }
 0x10e   : > { %499 = vmatmul.mubr.msk.f32.vlgmr.msra.gmra.mxu0 %vm302_vm1, %v277_v21 }
 0x1cc   : > { %v381_v22 = vpop.f32.mrf.mxu1 }
 0x1cd   : > { %388 = vst [vmem:[%s200_s25 + $0x10] sm:$0xff] %v381_v22 }
 0x1ce   : > { %v375_v23 = vpop.f32.mrf.mxu0  ;;  %v383_v24 = vpop.f32.mrf.mxu1 }
 0x1cf   : > { %386 = vst [vmem:[%s200_s25] sm:$0xff] %v375_v23  ;;  %389 = vst [vmem:[%s200_s25 + $0x18] sm:$0xff] %v383_v24 }
 0x1d0   : > { %v377_v25 = vpop.f32.mrf.mxu0 }
 0x1d1   : > { %387 = vst [vmem:[%s200_s25 + $0x8] sm:$0xff] %v377_v25 }
 0x1d2   : > { %660 = shalt.err (!%p657_p0)
}
 0x1d3   : > { %s661_s26 = scalar_lea.hbm %s876_s8, 512  ;;  %s665_s17 = scalar_lea.hbm %s921_s3, 4096 }
 0x1d4   : > { %p662_p5 = scmp.ne.s32.totalorder %s876_s8, %s661_s26  ;;  %p666_p1 = scmp.lt.s32.totalorder %s876_s8, %s921_s3 }
 0x1d5   : > { %p667_p4 = scmp.lt.s32.totalorder %s665_s17, %s661_s26 }
 0x1d6   : > { %p663_p9 = pnand %p662_p5, %p937_p3 }
 0x1d7   : > { %p668_p6 = por %p667_p4, %p666_p1 }
 0x1d8   : > { %p664_p11 = pneg %p663_p9 }
 0x1da   : > { %p669_p8 = pnand %p668_p6, %p664_p11 }
 0x1dc   : > { %672 = shalt.err (!%p669_p8)
}
 0x1dd   : > { %s723_s18 = smov 256   ;;  %s724_s25 = smov 16  }
 0x1de   : > { %537 = dma.vmem_to_hbm [thread:$0]  (%p937_p3), %s871_s28, 512, %s876_s8, %s391_s7, %s723_s18, %s723_s18, %s724_s25  }
 0x1df PF: > { %p554_p10 = scmp.ge.s32.totalorder %s715_s15, 2  ;;  %s419_s29 = sand.u32 1, %s703_s12  }
 0x1e0   : > { %p938_p7 = scmp.ne.s32.totalorder %s927_s19, 0  ;;  %s420_s30 = scalar_lea.sflag [#allocation4], %s419_s29 }
 0x1e2   : > { %p548_p12 = pnand %p554_p10, %p938_p7 }
 0x1e4   : > { %p549_p2 = pneg %p548_p12 }
 0x1e6   : > { %698 = dma.done.wait (%p549_p2), %s420_s30, 512  }
 0x1e7   : > { %700 = vsyncadd (%p549_p2), %s420_s30, 4294966784  ;;  %p17_p13 = scmp.ge.s32.totalorder %s798_s24, 10   ;;  %s939_s12 = smov %s707_s13 }
 0x1e8   : > { %s940_s13 = smov %s711_s14  ;;  %s941_s14 = smov %s815_s5 }
 0x1e9   : > { %s942_s15 = smov %s798_s24  ;;  %19 = sbr.rel (!%p17_p13) target bundleno = 6 (0x6), region = 81 }
 0x1ee   :  { %425 = vsyncpa [#allocation3], 1 }
 0x1ef   :  { %427 = vsyncpa [#allocation3 + $0x1], 1 }
 0x1f0   :  { %428 = vsyncpa [#allocation6], 1 }
 0x1f1   :  { %429 = vsyncpa [#allocation4], 1 }
 0x1f2   :  { %431 = vsyncpa [#allocation4 + $0x1], 1 }

</bundles_post_ra>
